<compile_context>
chip_gen: v5e
topology: v5e:2x2
jax: 0.10.0
libtpu: 0.0.40
codegen_flags: <defaults>
</compile_context>

<pallas_src>
import functools
import math

import jax
import jax.numpy as jnp
from jax.experimental import pallas as pl
from jax.experimental.pallas import tpu as pltpu

_LANES = 128
_SUBLANES = 8


def _dice_kernel(logits_ref, targets_ref, inter_out_ref, union_out_ref,
                 acc_inter_ref, acc_union_ref,
                 *, valid_rows, row_tile, inner_steps):
    s = pl.program_id(0)   # shard axis (dual-TC on v7x)
    i = pl.program_id(1)   # sequential reduction axis

    @pl.when(i == 0)
    def _():
        acc_inter_ref[...] = jnp.zeros_like(acc_inter_ref)
        acc_union_ref[...] = jnp.zeros_like(acc_union_ref)

    # Scalar test: is this block fully inside the valid row range?  Clamped
    # duplicate blocks on the last shard have block_row0 >= valid_rows and
    # therefore always take the masked path (contributing exactly zero).
    block_row0 = (s * inner_steps + i) * row_tile
    is_full = (block_row0 + row_tile) <= valid_rows

    p = jax.nn.sigmoid(logits_ref[...].astype(jnp.float32))   # EUP
    t = targets_ref[...].astype(jnp.float32)
    inter = p * t
    union = p + t

    n_groups = row_tile // _SUBLANES

    def _fold(x):
        # (row_tile, 128) -> (8, 128): sublane-group preserving vreg sum
        # (pure VPU adds, no XLU); keeps the accumulator at one vreg.
        return x.reshape(n_groups, _SUBLANES, _LANES).sum(axis=0)

    @pl.when(is_full)
    def _():
        # Steady-state fast path: no index mask at all.
        acc_inter_ref[...] += _fold(inter)
        acc_union_ref[...] += _fold(union)

    @pl.when(jnp.logical_not(is_full))
    def _():
        # Partial / duplicate blocks only.  Use select (not multiply-by-mask)
        # so stale-VMEM NaNs in the padded region cannot propagate.
        row_ids = jax.lax.broadcasted_iota(jnp.int32, (row_tile, _LANES), 0)
        valid = (block_row0 + row_ids) < valid_rows
        zeros = jnp.zeros_like(inter)
        acc_inter_ref[...] += _fold(jnp.where(valid, inter, zeros))
        acc_union_ref[...] += _fold(jnp.where(valid, union, zeros))

    @pl.when(i == pl.num_programs(1) - 1)
    def _():
        # One dense (8, 128) store per shard; final tiny reduction is done in
        # the wrapper on a (num_shards, 8, 128) array.
        inter_out_ref[0] = acc_inter_ref[...]
        union_out_ref[0] = acc_union_ref[...]


def _detect_num_tensorcores():
    """Best-effort TensorCore count (1 on v5e/v6e, 2 on v7x)."""
    try:
        info = pltpu.get_tpu_info()
        for attr in ("num_cores", "tensorcore_count", "num_tensorcores",
                     "core_count"):
            n = getattr(info, attr, None)
            if n:
                return max(1, min(2, int(n)))
    except Exception:
        pass
    return 1


def dice_loss(logits, targets, eps=1e-9, row_tile=2048, num_shards=None,
              core_parallel=False):
    """1 - (2*sum(sigmoid(logits)*targets) + eps) / (sum(sigmoid)+sum(targets))."""
    assert logits.shape == targets.shape
    total = math.prod(logits.shape)

    lf = logits.reshape(-1)
    tf = targets.reshape(-1)

    main = (total // _LANES) * _LANES
    tail_inter = jnp.float32(0.0)
    tail_union = jnp.float32(0.0)
    if main != total:
        # <=127-element tail: summed in plain JAX (negligible cost) instead of
        # a full-array jnp.pad copy of both inputs.
        p_tail = jax.nn.sigmoid(lf[main:].astype(jnp.float32))
        t_tail = tf[main:].astype(jnp.float32)
        tail_inter = jnp.sum(p_tail * t_tail)
        tail_union = jnp.sum(p_tail) + jnp.sum(t_tail)
        lf = lf[:main]
        tf = tf[:main]

    if main == 0:
        # Degenerate (< 128 elements): pure JAX.
        return 1.0 - (2.0 * tail_inter + eps) / tail_union

    rows = main // _LANES
    l2d = lf.reshape(rows, _LANES)       # reshape only: no HBM copy
    t2d = tf.reshape(rows, _LANES)

    # row_tile: multiple of 8 (sublanes), never larger than the (padded up to
    # a multiple of 8) row count so the block shape always satisfies the
    # (8, 128) divisibility rule; edge rows are handled by the in-kernel mask.
    row_tile = max(_SUBLANES,
                   ((int(row_tile) + _SUBLANES - 1) // _SUBLANES) * _SUBLANES)
    rows_padded = ((rows + _SUBLANES - 1) // _SUBLANES) * _SUBLANES
    row_tile = min(row_tile, rows_padded)

    total_row_blocks = pl.cdiv(rows, row_tile)

    if num_shards is None:
        num_shards = _detect_num_tensorcores()
    num_shards = max(1, min(int(num_shards), total_row_blocks))
    inner_steps = pl.cdiv(total_row_blocks, num_shards)
    last_block = total_row_blocks - 1

    if num_shards * inner_steps == total_row_blocks:
        def in_map(s, i, inner=inner_steps):
            return (s * inner + i, 0)
    else:
        # Clamp so the input DMA never starts past the end of the slab; the
        # clamped duplicates take the masked path and contribute zero.
        def in_map(s, i, inner=inner_steps, last=last_block):
            return (jnp.minimum(s * inner + i, last), 0)

    kernel = functools.partial(
        _dice_kernel, valid_rows=rows, row_tile=row_tile,
        inner_steps=inner_steps)

    # On v7x, set core_parallel=True (and verify in the trace) to force the
    # shard axis onto both TensorCores; plain "parallel" is the safe default.
    shard_sem = "parallel"
    if core_parallel and num_shards > 1:
        shard_sem = pltpu.CORE_PARALLEL

    inter_part, union_part = pl.pallas_call(
        kernel,
        out_shape=(
            jax.ShapeDtypeStruct((num_shards, _SUBLANES, _LANES), jnp.float32),
            jax.ShapeDtypeStruct((num_shards, _SUBLANES, _LANES), jnp.float32),
        ),
        grid_spec=pltpu.PrefetchScalarGridSpec(
            num_scalar_prefetch=0,
            grid=(num_shards, inner_steps),
            in_specs=[
                pl.BlockSpec((row_tile, _LANES), in_map),
                pl.BlockSpec((row_tile, _LANES), in_map),
            ],
            out_specs=[
                pl.BlockSpec((1, _SUBLANES, _LANES), lambda s, i: (s, 0, 0)),
                pl.BlockSpec((1, _SUBLANES, _LANES), lambda s, i: (s, 0, 0)),
            ],
            scratch_shapes=[
                pltpu.VMEM((_SUBLANES, _LANES), jnp.float32),
                pltpu.VMEM((_SUBLANES, _LANES), jnp.float32),
            ],
        ),
        compiler_params=pltpu.CompilerParams(
            dimension_semantics=(shard_sem, "arbitrary")),
    )(l2d, t2d)

    intersection = 2.0 * (jnp.sum(inter_part) + tail_inter)
    union = jnp.sum(union_part) + tail_union
    # eps only in the numerator, matching the PyTorch module exactly.
    dice_score = (intersection + eps) / union
    return 1.0 - dice_score


def dice_loss_ref(logits, targets, eps=1e-9):
    num = logits.shape[0]
    p = jax.nn.sigmoid(logits).reshape(num, -1)
    t = targets.reshape(num, -1)
    intersection = 2.0 * jnp.sum(p * t)
    union = jnp.sum(p) + jnp.sum(t)
    return 1.0 - (intersection + eps) / union


if __name__ == "__main__":
    key = jax.random.PRNGKey(0)
    k1, k2 = jax.random.split(key)

    B, C, H, W = 2, 4, 16, 16  # NCHW, like PyTorch
    logits = jax.random.normal(k1, (B, C, H, W), dtype=jnp.float32)
    targets = (jax.random.uniform(k2, (B, C, H, W)) > 0.5).astype(jnp.float32)

    out = dice_loss(logits, targets)
    out = jax.block_until_ready(out)

    ref = dice_loss_ref(logits, targets)
    assert jnp.allclose(out, ref, atol=1e-5, rtol=1e-5), (out, ref)

    print("KERNEL_OK")
</pallas_src>

<mosaic_0001>
module attributes {stable_mosaic.version = 11 : i64} {
  func.func @_dice_kernel(%arg0: i32, %arg1: i32, %arg2: memref<16x128xf32, #tpu.memory_space<vmem>>, %arg3: memref<16x128xf32, #tpu.memory_space<vmem>>, %arg4: memref<1x8x128xf32, #tpu.memory_space<vmem>>, %arg5: memref<1x8x128xf32, #tpu.memory_space<vmem>>, %arg6: memref<8x128xf32, #tpu.memory_space<vmem>>, %arg7: memref<8x128xf32, #tpu.memory_space<vmem>>) attributes {dimension_semantics = [#tpu.dimension_semantics<parallel>, #tpu.dimension_semantics<arbitrary>], iteration_bounds = array<i64: 1, 1>, scalar_prefetch = 0 : i64, scratch_operands = 2 : i64, tpu.core_type = #tpu.core_type<tc>, window_params = [{transform_indices = @transform_0, window_bounds = array<i64: 16, 128>}, {transform_indices = @transform_1, window_bounds = array<i64: 16, 128>}, {transform_indices = @transform_2, window_bounds = array<i64: 1, 8, 128>}, {transform_indices = @transform_3, window_bounds = array<i64: 1, 8, 128>}]} {
    %c0_i32 = arith.constant 0 : i32
    %0 = arith.cmpi eq, %arg1, %c0_i32 : i32
    %1 = arith.extui %0 : i1 to i32
    %c0_i32_0 = arith.constant 0 : i32
    %2 = arith.cmpi ne, %1, %c0_i32_0 : i32
    scf.if %2 {
      %cst_10 = arith.constant 0.000000e+00 : f32
      %25 = vector.broadcast %cst_10 : f32 to vector<8x128xf32>
      %c0_11 = arith.constant 0 : index
      %c0_12 = arith.constant 0 : index
      %26 = vector.load %arg6[%c0_11, %c0_12] : memref<8x128xf32, #tpu.memory_space<vmem>>, vector<8x128xf32>
      tpu.vector_store %arg6[%c0_11, %c0_12], %25 {strides = array<i32>} : memref<8x128xf32, #tpu.memory_space<vmem>>, vector<8x128xf32>,
      %cst_13 = arith.constant 0.000000e+00 : f32
      %27 = vector.broadcast %cst_13 : f32 to vector<8x128xf32>
      %c0_14 = arith.constant 0 : index
      %c0_15 = arith.constant 0 : index
      %28 = vector.load %arg7[%c0_14, %c0_15] : memref<8x128xf32, #tpu.memory_space<vmem>>, vector<8x128xf32>
      tpu.vector_store %arg7[%c0_14, %c0_15], %27 {strides = array<i32>} : memref<8x128xf32, #tpu.memory_space<vmem>>, vector<8x128xf32>,
    } else {
    }
    %c1_i32 = arith.constant 1 : i32
    %3 = arith.muli %arg0, %c1_i32 : i32
    %4 = arith.addi %3, %arg1 : i32
    %c16_i32 = arith.constant 16 : i32
    %5 = arith.muli %4, %c16_i32 : i32
    %c16_i32_1 = arith.constant 16 : i32
    %6 = arith.addi %5, %c16_i32_1 : i32
    %c16_i32_2 = arith.constant 16 : i32
    %7 = arith.cmpi sle, %6, %c16_i32_2 : i32
    %c0 = arith.constant 0 : index
    %c0_3 = arith.constant 0 : index
    %8 = vector.load %arg2[%c0, %c0_3] : memref<16x128xf32, #tpu.memory_space<vmem>>, vector<16x128xf32>
    %9 = arith.negf %8 : vector<16x128xf32>
    %10 = math.exp %9 : vector<16x128xf32>
    %cst = arith.constant 1.000000e+00 : f32
    %11 = vector.broadcast %cst : f32 to vector<16x128xf32>
    %12 = arith.addf %11, %10 : vector<16x128xf32>
    %13 = arith.divf %11, %12 : vector<16x128xf32>
    %c0_4 = arith.constant 0 : index
    %c0_5 = arith.constant 0 : index
    %14 = vector.load %arg3[%c0_4, %c0_5] : memref<16x128xf32, #tpu.memory_space<vmem>>, vector<16x128xf32>
    %15 = arith.mulf %13, %14 : vector<16x128xf32>
    %16 = arith.addf %13, %14 : vector<16x128xf32>
    %17 = arith.extui %7 : i1 to i32
    %c0_i32_6 = arith.constant 0 : i32
    %18 = arith.cmpi ne, %17, %c0_i32_6 : i32
    scf.if %18 {
      %c0_10 = arith.constant 0 : index
      %c0_11 = arith.constant 0 : index
      %25 = vector.load %arg6[%c0_10, %c0_11] : memref<8x128xf32, #tpu.memory_space<vmem>>, vector<8x128xf32>
      %26 = vector.shape_cast %15 : vector<16x128xf32> to vector<2x8x128xf32>
      %cst_12 = arith.constant dense<0.000000e+00> : vector<8x128xf32>
      %27 = vector.multi_reduction <add>, %26, %cst_12 [0] : vector<2x8x128xf32> to vector<8x128xf32>
      %28 = arith.addf %25, %27 : vector<8x128xf32>
      %c0_13 = arith.constant 0 : index
      %c0_14 = arith.constant 0 : index
      %29 = vector.load %arg6[%c0_13, %c0_14] : memref<8x128xf32, #tpu.memory_space<vmem>>, vector<8x128xf32>
      tpu.vector_store %arg6[%c0_13, %c0_14], %28 {strides = array<i32>} : memref<8x128xf32, #tpu.memory_space<vmem>>, vector<8x128xf32>,
      %c0_15 = arith.constant 0 : index
      %c0_16 = arith.constant 0 : index
      %30 = vector.load %arg7[%c0_15, %c0_16] : memref<8x128xf32, #tpu.memory_space<vmem>>, vector<8x128xf32>
      %31 = vector.shape_cast %16 : vector<16x128xf32> to vector<2x8x128xf32>
      %cst_17 = arith.constant dense<0.000000e+00> : vector<8x128xf32>
      %32 = vector.multi_reduction <add>, %31, %cst_17 [0] : vector<2x8x128xf32> to vector<8x128xf32>
      %33 = arith.addf %30, %32 : vector<8x128xf32>
      %c0_18 = arith.constant 0 : index
      %c0_19 = arith.constant 0 : index
      %34 = vector.load %arg7[%c0_18, %c0_19] : memref<8x128xf32, #tpu.memory_space<vmem>>, vector<8x128xf32>
      tpu.vector_store %arg7[%c0_18, %c0_19], %33 {strides = array<i32>} : memref<8x128xf32, #tpu.memory_space<vmem>>, vector<8x128xf32>,
    } else {
    }
    %true = arith.constant true
    %19 = arith.xori %7, %true : i1
    %20 = arith.extui %19 : i1 to i32
    %c0_i32_7 = arith.constant 0 : i32
    %21 = arith.cmpi ne, %20, %c0_i32_7 : i32
    scf.if %21 {
      %25 = tpu.iota {dimensions = array<i32: 0>} : vector<16x128xi32>
      %26 = vector.broadcast %5 : i32 to vector<16x128xi32>
      %27 = arith.addi %26, %25 : vector<16x128xi32>
      %c16_i32_10 = arith.constant 16 : i32
      %28 = vector.broadcast %c16_i32_10 : i32 to vector<16x128xi32>
      %29 = arith.cmpi slt, %27, %28 : vector<16x128xi32>
      %cst_11 = arith.constant 0.000000e+00 : f32
      %30 = vector.broadcast %cst_11 : f32 to vector<16x128xf32>
      %c0_12 = arith.constant 0 : index
      %c0_13 = arith.constant 0 : index
      %31 = vector.load %arg6[%c0_12, %c0_13] : memref<8x128xf32, #tpu.memory_space<vmem>>, vector<8x128xf32>
      %32 = arith.select %29, %15, %30 : vector<16x128xi1>, vector<16x128xf32>
      %33 = vector.shape_cast %32 : vector<16x128xf32> to vector<2x8x128xf32>
      %cst_14 = arith.constant dense<0.000000e+00> : vector<8x128xf32>
      %34 = vector.multi_reduction <add>, %33, %cst_14 [0] : vector<2x8x128xf32> to vector<8x128xf32>
      %35 = arith.addf %31, %34 : vector<8x128xf32>
      %c0_15 = arith.constant 0 : index
      %c0_16 = arith.constant 0 : index
      %36 = vector.load %arg6[%c0_15, %c0_16] : memref<8x128xf32, #tpu.memory_space<vmem>>, vector<8x128xf32>
      tpu.vector_store %arg6[%c0_15, %c0_16], %35 {strides = array<i32>} : memref<8x128xf32, #tpu.memory_space<vmem>>, vector<8x128xf32>,
      %c0_17 = arith.constant 0 : index
      %c0_18 = arith.constant 0 : index
      %37 = vector.load %arg7[%c0_17, %c0_18] : memref<8x128xf32, #tpu.memory_space<vmem>>, vector<8x128xf32>
      %38 = arith.select %29, %16, %30 : vector<16x128xi1>, vector<16x128xf32>
      %39 = vector.shape_cast %38 : vector<16x128xf32> to vector<2x8x128xf32>
      %cst_19 = arith.constant dense<0.000000e+00> : vector<8x128xf32>
      %40 = vector.multi_reduction <add>, %39, %cst_19 [0] : vector<2x8x128xf32> to vector<8x128xf32>
      %41 = arith.addf %37, %40 : vector<8x128xf32>
      %c0_20 = arith.constant 0 : index
      %c0_21 = arith.constant 0 : index
      %42 = vector.load %arg7[%c0_20, %c0_21] : memref<8x128xf32, #tpu.memory_space<vmem>>, vector<8x128xf32>
      tpu.vector_store %arg7[%c0_20, %c0_21], %41 {strides = array<i32>} : memref<8x128xf32, #tpu.memory_space<vmem>>, vector<8x128xf32>,
    } else {
    }
    %c0_i32_8 = arith.constant 0 : i32
    %22 = arith.cmpi eq, %arg1, %c0_i32_8 : i32
    %23 = arith.extui %22 : i1 to i32
    %c0_i32_9 = arith.constant 0 : i32
    %24 = arith.cmpi ne, %23, %c0_i32_9 : i32
    scf.if %24 {
      %c0_10 = arith.constant 0 : index
      %c0_11 = arith.constant 0 : index
      %25 = vector.load %arg6[%c0_10, %c0_11] : memref<8x128xf32, #tpu.memory_space<vmem>>, vector<8x128xf32>
      %c0_12 = arith.constant 0 : index
      %c0_13 = arith.constant 0 : index
      %c0_14 = arith.constant 0 : index
      %26 = vector.load %arg4[%c0_12, %c0_13, %c0_14] : memref<1x8x128xf32, #tpu.memory_space<vmem>>, vector<1x8x128xf32>
      %27 = vector.shape_cast %26 : vector<1x8x128xf32> to vector<8x128xf32>
      %28 = vector.shape_cast %25 : vector<8x128xf32> to vector<1x8x128xf32>
      tpu.vector_store %arg4[%c0_12, %c0_13, %c0_14], %28 {strides = array<i32>} : memref<1x8x128xf32, #tpu.memory_space<vmem>>, vector<1x8x128xf32>,
      %c0_15 = arith.constant 0 : index
      %c0_16 = arith.constant 0 : index
      %29 = vector.load %arg7[%c0_15, %c0_16] : memref<8x128xf32, #tpu.memory_space<vmem>>, vector<8x128xf32>
      %c0_17 = arith.constant 0 : index
      %c0_18 = arith.constant 0 : index
      %c0_19 = arith.constant 0 : index
      %30 = vector.load %arg5[%c0_17, %c0_18, %c0_19] : memref<1x8x128xf32, #tpu.memory_space<vmem>>, vector<1x8x128xf32>
      %31 = vector.shape_cast %30 : vector<1x8x128xf32> to vector<8x128xf32>
      %32 = vector.shape_cast %29 : vector<8x128xf32> to vector<1x8x128xf32>
      tpu.vector_store %arg5[%c0_17, %c0_18, %c0_19], %32 {strides = array<i32>} : memref<1x8x128xf32, #tpu.memory_space<vmem>>, vector<1x8x128xf32>,
    } else {
    }
    return
  }
  func.func @transform_0(%arg0: i32, %arg1: i32) -> (i32, i32) {
    %c1_i32 = arith.constant 1 : i32
    %0 = arith.muli %arg0, %c1_i32 : i32
    %1 = arith.addi %0, %arg1 : i32
    %c0_i32 = arith.constant 0 : i32
    %c0_i32_0 = arith.constant 0 : i32
    return %1, %c0_i32 : i32, i32
  }
  func.func @transform_1(%arg0: i32, %arg1: i32) -> (i32, i32) {
    %c1_i32 = arith.constant 1 : i32
    %0 = arith.muli %arg0, %c1_i32 : i32
    %1 = arith.addi %0, %arg1 : i32
    %c0_i32 = arith.constant 0 : i32
    %c0_i32_0 = arith.constant 0 : i32
    return %1, %c0_i32 : i32, i32
  }
  func.func @transform_2(%arg0: i32, %arg1: i32) -> (i32, i32, i32) {
    %c0_i32 = arith.constant 0 : i32
    %c0_i32_0 = arith.constant 0 : i32
    %c0_i32_1 = arith.constant 0 : i32
    return %arg0, %c0_i32, %c0_i32_0 : i32, i32, i32
  }
  func.func @transform_3(%arg0: i32, %arg1: i32) -> (i32, i32, i32) {
    %c0_i32 = arith.constant 0 : i32
    %c0_i32_0 = arith.constant 0 : i32
    %c0_i32_1 = arith.constant 0 : i32
    return %arg0, %c0_i32, %c0_i32_0 : i32, i32, i32
  }
}

</mosaic_0001>

<bundles_post_ra>
// kernel: tpu_custom_call.1
= control target key start
LH: loop header
LB: loop body
LE: loop exit
PB: predicated region body
PF: predicated region fallthrough
CT: control target
= control target key end

     0   :  { %9 = vsyncpa [#allocation5], 0  ;;  %s349_s0 = inlined_call_operand.hbm [shape: f32[16,128], index: 0, kind: input, shape index: {}]   ;;  %s350_s1 = inlined_call_operand.hbm [shape: f32[16,128], index: 1, kind: input, shape index: {}]   ;;  %s351_s2 = inlined_call_operand.hbm [shape: f32[1,8,128], index: 2, kind: output, shape index: {0}]   ;;  %s352_s3 = inlined_call_operand.hbm [shape: f32[1,8,128], index: 3, kind: output, shape index: {1}]  }
   0x1   :  { %10 = vsyncpa [#allocation8], 0 }
   0x2   :  { %11 = vsyncpa [#allocation6], 0 }
   0x3   :  { %12 = vsyncpa [#allocation11], 0  ;;  %s21_s14 = sshll.u32 %s349_s0, 4  ;;  %s311_s15 = smov [#allocation4]   ;;  %s22_s14 = int_to_ptr.hbm [resolvable:$true] %s21_s14 }
   0x4   :  { %s23_s16 = sshll.u32 %s311_s15, 4  ;;  %s38_s19 = sshll.u32 %s350_s1, 4  ;;  %s24_s16 = int_to_ptr.vmem [resolvable:$true] %s23_s16  ;;  %s39_s19 = int_to_ptr.hbm [resolvable:$true] %s38_s19 }
   0x5   :  { %s312_s20 = smov 128   ;;  %s313_s21 = smov 8  }
   0x6   :  { %29 = dma.hbm_to_vmem [thread:$0]  %s22_s14, 256, %s24_s16, [#allocation5], %s312_s20, %s312_s20, %s313_s21  }
   0x7   :  { %s314_s22 = smov [#allocation7]  }
   0x8   :  { %s40_s23 = sshll.u32 %s314_s22, 4  ;;  %s41_s23 = int_to_ptr.vmem [resolvable:$true] %s40_s23 }
   0x9   :  { %46 = dma.hbm_to_vmem [thread:$0]  %s39_s19, 256, %s41_s23, [#allocation8], %s312_s20, %s312_s20, %s313_s21  }
   0xa   :  { %303 = dma.done.wait [#allocation5], 256  }
   0xb   :  { %304 = vsyncadd [#allocation5], 4294967040 }
   0xc   :  { %305 = dma.done.wait [#allocation8], 256  }
   0xd   :  { %306 = vsyncadd [#allocation8], 4294967040  ;;  %v69_v0 = vld [vmem:[#allocation4] sm:$0xff]  ;;  %v70_v1 = vld [vmem:[#allocation4 + $0x8] sm:$0xff]  ;;  %s315_s0 = smov [#allocation9]   ;;  %s164_s26 = sshll.u32 %s351_s2, 4  ;;  %s165_s26 = int_to_ptr.hbm [resolvable:$true] %s164_s26 }
   0xe   :  { %v191_v2 = vmul.f32 -1.442695, %v69_v0  ;;  %v192_v3 = vmul.f32 -1.442695, %v70_v1  ;;  %v109_v24 = vld [vmem:[#allocation7] sm:$0xff]  ;;  %v110_v26 = vld [vmem:[#allocation7 + $0x8] sm:$0xff] }
   0xf   :  { %s162_s1 = sshll.u32 %s315_s0, 4  ;;  %s316_s27 = smov [#allocation10]   ;;  %s163_s1 = int_to_ptr.vmem [resolvable:$true] %s162_s1 }
  0x10   :  { %199 = vpow2.f32 %v191_v2  ;;  %s173_s28 = sshll.u32 %s316_s27, 4  ;;  %s175_s4 = sshll.u32 %s352_s3, 4  ;;  %s174_s28 = int_to_ptr.vmem [resolvable:$true] %s173_s28  ;;  %s176_s4 = int_to_ptr.hbm [resolvable:$true] %s175_s4 }
  0x11   :  { %201 = vpow2.f32 %v192_v3 }
  0x16   :  { %v200_v4 = vpop.eup %199 }
  0x17   :  { %v202_v5 = vpop.eup %201  ;;  %v77_v6 = vadd.f32 1.0, %v200_v4 }
  0x18   :  { %v78_v7 = vadd.f32 1.0, %v202_v5 }
  0x19   :  { %203 = vrcp.f32 %v77_v6  ;;  %vm84_vm0 = vweird.f32 %v77_v6  ;;  %v90_v11 = vand.u32 2147483648, %v77_v6  ;;  %v88_v14 = vand.u32 2147483647, %v77_v6 }
  0x1a   :  { %205 = vrcp.f32 %v78_v7  ;;  %v105_v15 = vand.u32 2147483648, %v78_v7  ;;  %vm99_vm2 = vweird.f32 %v78_v7  ;;  %v103_v17 = vand.u32 2147483647, %v78_v7 }
  0x1b   :  { %v91_v19 = vor.u32 1.1754944e-38, %v90_v11  ;;  %vm89_vm5 = vcmp.eq.f32.partialorder %v88_v14, 8.507059e+37 }
  0x1c   :  { %v106_v22 = vor.u32 1.1754944e-38, %v105_v15  ;;  %vm104_vm7 = vcmp.eq.f32.partialorder %v103_v17, 8.507059e+37 }
  0x1f   :  { %v204_v8 = vpop.eup %203 }
  0x20   :  { %v206_v9 = vpop.eup %205  ;;  %v80_v10 = vmul.f32 %v204_v8, %v77_v6  ;;  %vm85_vm1 = vweird.f32 %v204_v8 }
  0x21   :  { %v95_v12 = vmul.f32 %v206_v9, %v78_v7  ;;  %vm100_vm3 = vweird.f32 %v206_v9  ;;  %vm86_vm4 = vmor %vm84_vm0, %vm85_vm1 }
  0x22   :  { %v81_v13 = vsub.f32 1.0, %v80_v10  ;;  %vm101_vm6 = vmor %vm99_vm2, %vm100_vm3 }
  0x23   :  { %v96_v16 = vsub.f32 1.0, %v95_v12 }
  0x24   :  { %v82_v18 = vmul.f32 %v204_v8, %v81_v13 }
  0x25   :  { %v97_v20 = vmul.f32 %v206_v9, %v96_v16 }
  0x26   :  { %v83_v21 = vadd.f32 %v204_v8, %v82_v18 }
  0x27   :  { %v98_v23 = vadd.f32 %v206_v9, %v97_v20 }
  0x28   :  { %v87_v25 = vsel %vm86_vm4, %v204_v8, %v83_v21 }
  0x29   :  { %v92_v27 = vsel %vm89_vm5, %v91_v19, %v87_v25  ;;  %v102_v28 = vsel %vm101_vm6, %v206_v9, %v98_v23 }
  0x2a   :  { %v107_v29 = vsel %vm104_vm7, %v106_v22, %v102_v28  ;;  %v111_v30 = vmul.f32 %v109_v24, %v92_v27  ;;  %v113_v31 = vadd.f32 %v109_v24, %v92_v27 }
  0x2b   :  { %v112_v32 = vmul.f32 %v110_v26, %v107_v29  ;;  %v114_v33 = vadd.f32 %v110_v26, %v107_v29 }
  0x2d   :  { %v119_v34 = vadd.f32 %v112_v32, %v111_v30  ;;  %v123_v35 = vadd.f32 %v114_v33, %v113_v31 }
  0x2f   :  { %154 = vst [vmem:[#allocation9] sm:$0xff] %v119_v34 }
  0x30   :  { %156 = vst [vmem:[#allocation10] sm:$0xff] %v123_v35  ;;  %167 = dma.vmem_to_hbm [thread:$0]  %s163_s1, 128, %s165_s26, [#allocation6]  }
  0x31   :  { %178 = dma.vmem_to_hbm [thread:$0]  %s174_s28, 128, %s176_s4, [#allocation11]  }
  0x32   :  { %307 = dma.done.wait [#allocation6], 128  }
  0x33   :  { %308 = vsyncadd [#allocation6], 4294967168 }
  0x34   :  { %309 = dma.done.wait [#allocation11], 128  }
  0x35   :  { %310 = vsyncadd [#allocation11], 4294967168 }
  0x36   :  { %187 = vsyncpa [#allocation5], 1 }
  0x37   :  { %188 = vsyncpa [#allocation8], 1 }
  0x38   :  { %189 = vsyncpa [#allocation6], 1 }
  0x39   :  { %190 = vsyncpa [#allocation11], 1 }

</bundles_post_ra>
